<compile_context>
chip_gen: v5e
topology: v5e:2x2
jax: 0.10.0
libtpu: 0.0.40
codegen_flags: <defaults>
</compile_context>

<pallas_src>
import functools
import math

import jax
import jax.numpy as jnp
from jax import lax
from jax.experimental import pallas as pl
from jax.experimental.pallas import tpu as pltpu


# ---------------------------------------------------------------------------
# Fused Pallas kernel (whole forward, VMEM resident, no grid)
# ---------------------------------------------------------------------------
def _dvgrl_fused_kernel(
    onehot_ref,                    # (B, U)   bf16  one-hot user selector
    graph_ref, sgraph_ref,         # (U, I), (U, U)   bf16 dense graphs
    qw_ref, qb_ref,                # (I, 2E) bf16, (1, 2E) f32
    sw_ref, sb_ref,                # (U, 2E) bf16, (1, 2E) f32
    w1_ref, b1_ref, w2_ref,        # (2E, E) bf16, (1, E) f32, (1, E) f32
    wp_ref, bp_ref,                # (E, I)  bf16, (1, I) f32
    wsp_ref, bsp_ref,              # (E, U)  bf16, (1, U) f32
    hhs_ref,                       # out: (U, 4E) f32  [mu | logvar | s_mu | s_logvar]
    ra_ref, rs_ref,                # out: (B, I), (B, U) f32
    uzsz_ref,                      # out: (B, 2E) f32  [u_z | s_z]
):
    f32 = jnp.float32
    bf16 = jnp.bfloat16
    E = b1_ref.shape[1]

    # ---- encoders: h = Graph @ Wq + bq, hs = S_Graph @ Ws + bs
    # bf16 operands (graph is 0/1 -> exact), f32 accumulation.
    h = jnp.dot(graph_ref[...], qw_ref[...], preferred_element_type=f32) + qb_ref[...]
    hs = jnp.dot(sgraph_ref[...], sw_ref[...], preferred_element_type=f32) + sb_ref[...]

    # Pack [h | hs] into one lane-dense (U, 4E) = (128, 256) tile: single
    # output store and a single fused gather dot below.
    hhs = jnp.concatenate([h, hs], axis=1)
    hhs_ref[...] = hhs

    # ---- fused gather of the requested user rows: ONE one-hot matmul
    b_all = jnp.dot(onehot_ref[...], hhs.astype(bf16),
                    preferred_element_type=f32)                    # (B, 4E)
    mu_b = b_all[:, :E]
    lv_b = b_all[:, E:2 * E]
    smu_b = b_all[:, 2 * E:3 * E]
    slv_b = b_all[:, 3 * E:]

    # ---- eval-mode reparameterize: z = mu + exp(0.5 * logvar)
    u_z = mu_b + jnp.exp(0.5 * lv_b)                               # (B, E)
    s_z = smu_b + jnp.exp(0.5 * slv_b)                             # (B, E)

    # ---- hoisted [u_z | s_z] concat: (B, 2E) = (8, 128) lane dense, reused
    # for both the attention dot and the packed output store.
    uz_sz = jnp.concatenate([u_z, s_z], axis=1)
    uzsz_ref[...] = uz_sz

    # ---- attention MLP: Linear(2E, E) -> tanh -> Linear(E, 1, no bias)
    a1 = jnp.tanh(
        jnp.dot(uz_sz.astype(bf16), w1_ref[...], preferred_element_type=f32)
        + b1_ref[...]
    )                                                              # (B, E)
    score = jnp.sum(a1 * w2_ref[...], axis=-1, keepdims=True)      # (B, 1)
    z = score * u_z + (1.0 - score) * s_z                          # (B, E)

    # ---- decoders (bf16 operands, f32 accumulate)
    ra_ref[...] = (jnp.dot(z.astype(bf16), wp_ref[...],
                           preferred_element_type=f32) + bp_ref[...])
    rs_ref[...] = (jnp.dot(s_z.astype(bf16), wsp_ref[...],
                           preferred_element_type=f32) + bsp_ref[...])


# ---------------------------------------------------------------------------
# JAX wrapper
# ---------------------------------------------------------------------------
def dvgrl_forward(inputs, graph, s_graph, params, *, embedding_dim):
    E = embedding_dim
    U, I = graph.shape
    B = inputs.shape[0]
    bf16 = jnp.bfloat16

    # One-hot selector built in the wrapper (bf16, ~2 KiB).  NOTE: an index
    # outside [0, U) yields an all-zero row (PyTorch indexing would raise).
    onehot = jax.nn.one_hot(inputs.astype(jnp.int32), U, dtype=bf16)   # (B, U)

    args = (
        onehot,
        graph.astype(bf16), s_graph.astype(bf16),
        params["q_w"].astype(bf16), params["q_b"].reshape(1, 2 * E),
        params["s_w"].astype(bf16), params["s_b"].reshape(1, 2 * E),
        params["att_w1"].astype(bf16), params["att_b1"].reshape(1, E),
        params["att_w2"].reshape(1, E),
        params["p_w"].astype(bf16), params["p_b"].reshape(1, I),
        params["sp_w"].astype(bf16), params["sp_b"].reshape(1, U),
    )
    out_shapes = (
        jax.ShapeDtypeStruct((U, 4 * E), jnp.float32),   # [mu|logvar|s_mu|s_logvar]
        jax.ShapeDtypeStruct((B, I), jnp.float32),       # recon_A
        jax.ShapeDtypeStruct((B, U), jnp.float32),       # recon_S
        jax.ShapeDtypeStruct((B, 2 * E), jnp.float32),   # [u_z | s_z]
    )

    # advisory cost estimate so XLA schedules around this tiny custom call
    flops = 2 * (U * I * 2 * E + U * U * 2 * E          # encoders
                 + B * U * 4 * E                        # fused one-hot gather
                 + B * 2 * E * E                        # attention dense
                 + B * E * I + B * E * U)               # decoders
    transcendentals = B * 2 * E + B * E                 # exp + tanh
    in_bytes = sum(math.prod(a.shape) * jnp.dtype(a.dtype).itemsize for a in args)
    out_bytes = sum(math.prod(s.shape) * jnp.dtype(s.dtype).itemsize
                    for s in out_shapes)

    vmem_spec = pl.BlockSpec(memory_space=pltpu.MemorySpace.VMEM)
    hhs, recon_A, recon_S, uzsz = pl.pallas_call(
        _dvgrl_fused_kernel,
        out_shape=out_shapes,
        in_specs=[vmem_spec] * len(args),
        out_specs=tuple(vmem_spec for _ in out_shapes),
        cost_estimate=pl.CostEstimate(
            flops=int(flops),
            transcendentals=int(transcendentals),
            bytes_accessed=int(in_bytes + out_bytes),
        ),
    )(*args)

    # cheap static lane slices of the packed, lane-dense kernel outputs
    mu, logvar = hhs[:, :E], hhs[:, E:2 * E]
    s_mu, s_logvar = hhs[:, 2 * E:3 * E], hhs[:, 3 * E:]
    u_z, s_z = uzsz[:, :E], uzsz[:, E:]
    return recon_A, recon_S, mu, logvar, s_mu, s_logvar, u_z, s_z


# Pure-f32 JAX reference (matches the PyTorch eval-mode forward).
def dvgrl_forward_ref(inputs, graph, s_graph, params, *, embedding_dim):
    E = embedding_dim
    h = graph @ params["q_w"] + params["q_b"]
    mu, logvar = h[:, :E], h[:, E:]
    hs = s_graph @ params["s_w"] + params["s_b"]
    s_mu, s_logvar = hs[:, :E], hs[:, E:]
    idx = inputs.astype(jnp.int32)
    u_z = mu[idx] + jnp.exp(0.5 * logvar[idx])
    s_z = s_mu[idx] + jnp.exp(0.5 * s_logvar[idx])
    all_z = jnp.concatenate([u_z, s_z], axis=1)
    a1 = jnp.tanh(all_z @ params["att_w1"] + params["att_b1"])
    score = a1 @ params["att_w2"].reshape(E, 1)
    z = score * u_z + (1.0 - score) * s_z
    recon_A = z @ params["p_w"] + params["p_b"]
    recon_S = s_z @ params["sp_w"] + params["sp_b"]
    return recon_A, recon_S, mu, logvar, s_mu, s_logvar, u_z, s_z


# ---------------------------------------------------------------------------
# Deterministic parameter init (uniform +/- 1/sqrt(fan_in), like nn.Linear)
# ---------------------------------------------------------------------------
def init_params(key, num_users, num_items, E):
    def lin(k, fan_in, fan_out, bias=True):
        kw, kb = jax.random.split(k)
        bound = 1.0 / jnp.sqrt(fan_in)
        w = jax.random.uniform(kw, (fan_in, fan_out), jnp.float32, -bound, bound)
        b = (jax.random.uniform(kb, (fan_out,), jnp.float32, -bound, bound)
             if bias else None)
        return w, b

    keys = jax.random.split(key, 6)
    q_w, q_b = lin(keys[0], num_items, 2 * E)          # q_layers[0]
    s_w, s_b = lin(keys[1], num_users, 2 * E)          # s_layers[0]
    a1_w, a1_b = lin(keys[2], 2 * E, E)                # attention_dense[0]
    a2_w, _ = lin(keys[3], E, 1, bias=False)           # attention_dense[2]
    p_w, p_b = lin(keys[4], E, num_items)              # p_layers[0]
    sp_w, sp_b = lin(keys[5], E, num_users)            # s_p_layers[0]
    return {
        "q_w": q_w, "q_b": q_b,
        "s_w": s_w, "s_b": s_b,
        "att_w1": a1_w, "att_b1": a1_b,
        "att_w2": a2_w.reshape(E),                      # stored as (E,)
        "p_w": p_w, "p_b": p_b,
        "sp_w": sp_w, "sp_b": sp_b,
    }


if __name__ == "__main__":
    U, I, E, B = 128, 256, 64, 8   # num_users, num_items, embedding_dim, batch

    key = jax.random.PRNGKey(0)
    k_par, k_g, k_sg, k_in = jax.random.split(key, 4)

    params = init_params(k_par, U, I, E)
    # synthetic (dense) bipartite user-item graph and social user-user graph
    graph = (jax.random.uniform(k_g, (U, I)) < 0.1).astype(jnp.float32)
    s_graph = (jax.random.uniform(k_sg, (U, U)) < 0.1).astype(jnp.float32)
    inputs = jax.random.randint(k_in, (B,), 0, U, dtype=jnp.int32)

    fwd = jax.jit(functools.partial(dvgrl_forward, embedding_dim=E))
    outs = jax.block_until_ready(fwd(inputs, graph, s_graph, params))

    refs = dvgrl_forward_ref(inputs, graph, s_graph, params, embedding_dim=E)
    # 3e-2 tolerance: every matmul runs with bf16 operands (f32 accumulation)
    # in the kernel while the reference is pure f32.
    for o, r in zip(outs, refs):
        assert o.shape == r.shape and o.dtype == r.dtype
        assert jnp.allclose(o, r, atol=3e-2, rtol=3e-2), "mismatch vs reference"

    print("KERNEL_OK")
</pallas_src>

<mosaic_0001>
module attributes {stable_mosaic.version = 11 : i64} {
  func.func @_dvgrl_fused_kernel(%arg0: memref<8x128xbf16, #tpu.memory_space<vmem>>, %arg1: memref<128x256xbf16, #tpu.memory_space<vmem>>, %arg2: memref<128x128xbf16, #tpu.memory_space<vmem>>, %arg3: memref<256x128xbf16, #tpu.memory_space<vmem>>, %arg4: memref<1x128xf32, #tpu.memory_space<vmem>>, %arg5: memref<128x128xbf16, #tpu.memory_space<vmem>>, %arg6: memref<1x128xf32, #tpu.memory_space<vmem>>, %arg7: memref<128x64xbf16, #tpu.memory_space<vmem>>, %arg8: memref<1x64xf32, #tpu.memory_space<vmem>>, %arg9: memref<1x64xf32, #tpu.memory_space<vmem>>, %arg10: memref<64x256xbf16, #tpu.memory_space<vmem>>, %arg11: memref<1x256xf32, #tpu.memory_space<vmem>>, %arg12: memref<64x128xbf16, #tpu.memory_space<vmem>>, %arg13: memref<1x128xf32, #tpu.memory_space<vmem>>, %arg14: memref<128x256xf32, #tpu.memory_space<vmem>>, %arg15: memref<8x256xf32, #tpu.memory_space<vmem>>, %arg16: memref<8x128xf32, #tpu.memory_space<vmem>>, %arg17: memref<8x128xf32, #tpu.memory_space<vmem>>) attributes {dimension_semantics = [], scalar_prefetch = 0 : i64, scratch_operands = 0 : i64, tpu.core_type = #tpu.core_type<tc>} {
    %c0 = arith.constant 0 : index
    %c0_0 = arith.constant 0 : index
    %0 = vector.load %arg1[%c0, %c0_0] : memref<128x256xbf16, #tpu.memory_space<vmem>>, vector<128x256xbf16>
    %c0_1 = arith.constant 0 : index
    %c0_2 = arith.constant 0 : index
    %1 = vector.load %arg3[%c0_1, %c0_2] : memref<256x128xbf16, #tpu.memory_space<vmem>>, vector<256x128xbf16>
    %cst = arith.constant dense<0.000000e+00> : vector<128x128xf32>
    %2 = tpu.matmul %0, %1, %cst {dimension_numbers = #tpu.dot_dimension_numbers<[1], [0], [0], [1], [0, 0, 1, 1], [], []>} : vector<128x256xbf16>, vector<256x128xbf16>, vector<128x128xf32> -> vector<128x128xf32>
    %c0_3 = arith.constant 0 : index
    %c0_4 = arith.constant 0 : index
    %3 = vector.load %arg4[%c0_3, %c0_4] : memref<1x128xf32, #tpu.memory_space<vmem>>, vector<1x128xf32>
    %4 = vector.broadcast %3 : vector<1x128xf32> to vector<128x128xf32>
    %5 = arith.addf %2, %4 : vector<128x128xf32>
    %c0_5 = arith.constant 0 : index
    %c0_6 = arith.constant 0 : index
    %6 = vector.load %arg2[%c0_5, %c0_6] : memref<128x128xbf16, #tpu.memory_space<vmem>>, vector<128x128xbf16>
    %c0_7 = arith.constant 0 : index
    %c0_8 = arith.constant 0 : index
    %7 = vector.load %arg5[%c0_7, %c0_8] : memref<128x128xbf16, #tpu.memory_space<vmem>>, vector<128x128xbf16>
    %cst_9 = arith.constant dense<0.000000e+00> : vector<128x128xf32>
    %8 = tpu.matmul %6, %7, %cst_9 {dimension_numbers = #tpu.dot_dimension_numbers<[1], [0], [0], [1], [0, 0, 1, 1], [], []>} : vector<128x128xbf16>, vector<128x128xbf16>, vector<128x128xf32> -> vector<128x128xf32>
    %c0_10 = arith.constant 0 : index
    %c0_11 = arith.constant 0 : index
    %9 = vector.load %arg6[%c0_10, %c0_11] : memref<1x128xf32, #tpu.memory_space<vmem>>, vector<1x128xf32>
    %10 = vector.broadcast %9 : vector<1x128xf32> to vector<128x128xf32>
    %11 = arith.addf %8, %10 : vector<128x128xf32>
    %12 = tpu.concatenate %5, %11 in 1 : vector<128x128xf32>, vector<128x128xf32> -> vector<128x256xf32>
    %c0_12 = arith.constant 0 : index
    %c0_13 = arith.constant 0 : index
    %13 = vector.load %arg14[%c0_12, %c0_13] : memref<128x256xf32, #tpu.memory_space<vmem>>, vector<128x256xf32>
    tpu.vector_store %arg14[%c0_12, %c0_13], %12 {strides = array<i32>} : memref<128x256xf32, #tpu.memory_space<vmem>>, vector<128x256xf32>,
    %c0_14 = arith.constant 0 : index
    %c0_15 = arith.constant 0 : index
    %14 = vector.load %arg0[%c0_14, %c0_15] : memref<8x128xbf16, #tpu.memory_space<vmem>>, vector<8x128xbf16>
    %15 = arith.truncf %12 : vector<128x256xf32> to vector<128x256xbf16>
    %cst_16 = arith.constant dense<0.000000e+00> : vector<8x256xf32>
    %16 = tpu.matmul %14, %15, %cst_16 {dimension_numbers = #tpu.dot_dimension_numbers<[1], [0], [0], [1], [0, 0, 1, 1], [], []>} : vector<8x128xbf16>, vector<128x256xbf16>, vector<8x256xf32> -> vector<8x256xf32>
    %17 = vector.extract_strided_slice %16 {offsets = [0, 0], sizes = [8, 64], strides = [1, 1]} : vector<8x256xf32> to vector<8x64xf32>
    %18 = vector.extract_strided_slice %16 {offsets = [0, 64], sizes = [8, 64], strides = [1, 1]} : vector<8x256xf32> to vector<8x64xf32>
    %19 = vector.extract_strided_slice %16 {offsets = [0, 128], sizes = [8, 64], strides = [1, 1]} : vector<8x256xf32> to vector<8x64xf32>
    %20 = vector.extract_strided_slice %16 {offsets = [0, 192], sizes = [8, 64], strides = [1, 1]} : vector<8x256xf32> to vector<8x64xf32>
    %cst_17 = arith.constant 5.000000e-01 : f32
    %21 = vector.broadcast %cst_17 : f32 to vector<8x64xf32>
    %22 = arith.mulf %21, %18 : vector<8x64xf32>
    %23 = math.exp %22 : vector<8x64xf32>
    %24 = arith.addf %17, %23 : vector<8x64xf32>
    %cst_18 = arith.constant 5.000000e-01 : f32
    %25 = vector.broadcast %cst_18 : f32 to vector<8x64xf32>
    %26 = arith.mulf %25, %20 : vector<8x64xf32>
    %27 = math.exp %26 : vector<8x64xf32>
    %28 = arith.addf %19, %27 : vector<8x64xf32>
    %29 = tpu.concatenate %24, %28 in 1 : vector<8x64xf32>, vector<8x64xf32> -> vector<8x128xf32>
    %c0_19 = arith.constant 0 : index
    %c0_20 = arith.constant 0 : index
    %30 = vector.load %arg17[%c0_19, %c0_20] : memref<8x128xf32, #tpu.memory_space<vmem>>, vector<8x128xf32>
    tpu.vector_store %arg17[%c0_19, %c0_20], %29 {strides = array<i32>} : memref<8x128xf32, #tpu.memory_space<vmem>>, vector<8x128xf32>,
    %31 = arith.truncf %29 : vector<8x128xf32> to vector<8x128xbf16>
    %c0_21 = arith.constant 0 : index
    %c0_22 = arith.constant 0 : index
    %32 = vector.load %arg7[%c0_21, %c0_22] : memref<128x64xbf16, #tpu.memory_space<vmem>>, vector<128x64xbf16>
    %cst_23 = arith.constant dense<0.000000e+00> : vector<8x64xf32>
    %33 = tpu.matmul %31, %32, %cst_23 {dimension_numbers = #tpu.dot_dimension_numbers<[1], [0], [0], [1], [0, 0, 1, 1], [], []>} : vector<8x128xbf16>, vector<128x64xbf16>, vector<8x64xf32> -> vector<8x64xf32>
    %c0_24 = arith.constant 0 : index
    %c0_25 = arith.constant 0 : index
    %34 = vector.load %arg8[%c0_24, %c0_25] : memref<1x64xf32, #tpu.memory_space<vmem>>, vector<1x64xf32>
    %35 = vector.broadcast %34 : vector<1x64xf32> to vector<8x64xf32>
    %36 = arith.addf %33, %35 : vector<8x64xf32>
    %37 = math.tanh %36 : vector<8x64xf32>
    %c0_26 = arith.constant 0 : index
    %c0_27 = arith.constant 0 : index
    %38 = vector.load %arg9[%c0_26, %c0_27] : memref<1x64xf32, #tpu.memory_space<vmem>>, vector<1x64xf32>
    %39 = vector.broadcast %38 : vector<1x64xf32> to vector<8x64xf32>
    %40 = arith.mulf %37, %39 : vector<8x64xf32>
    %cst_28 = arith.constant dense<0.000000e+00> : vector<8xf32>
    %41 = vector.multi_reduction <add>, %40, %cst_28 [1] : vector<8x64xf32> to vector<8xf32>
    %42 = vector.shape_cast %41 : vector<8xf32> to vector<8x1xf32>
    %43 = vector.broadcast %42 : vector<8x1xf32> to vector<8x64xf32>
    %44 = arith.mulf %43, %24 : vector<8x64xf32>
    %cst_29 = arith.constant 1.000000e+00 : f32
    %45 = vector.broadcast %cst_29 : f32 to vector<8x1xf32>
    %46 = arith.subf %45, %42 : vector<8x1xf32>
    %47 = vector.broadcast %46 : vector<8x1xf32> to vector<8x64xf32>
    %48 = arith.mulf %47, %28 : vector<8x64xf32>
    %49 = arith.addf %44, %48 : vector<8x64xf32>
    %50 = arith.truncf %49 : vector<8x64xf32> to vector<8x64xbf16>
    %c0_30 = arith.constant 0 : index
    %c0_31 = arith.constant 0 : index
    %51 = vector.load %arg10[%c0_30, %c0_31] : memref<64x256xbf16, #tpu.memory_space<vmem>>, vector<64x256xbf16>
    %cst_32 = arith.constant dense<0.000000e+00> : vector<8x256xf32>
    %52 = tpu.matmul %50, %51, %cst_32 {dimension_numbers = #tpu.dot_dimension_numbers<[1], [0], [0], [1], [0, 0, 1, 1], [], []>} : vector<8x64xbf16>, vector<64x256xbf16>, vector<8x256xf32> -> vector<8x256xf32>
    %c0_33 = arith.constant 0 : index
    %c0_34 = arith.constant 0 : index
    %53 = vector.load %arg11[%c0_33, %c0_34] : memref<1x256xf32, #tpu.memory_space<vmem>>, vector<1x256xf32>
    %54 = vector.broadcast %53 : vector<1x256xf32> to vector<8x256xf32>
    %55 = arith.addf %52, %54 : vector<8x256xf32>
    %c0_35 = arith.constant 0 : index
    %c0_36 = arith.constant 0 : index
    %56 = vector.load %arg15[%c0_35, %c0_36] : memref<8x256xf32, #tpu.memory_space<vmem>>, vector<8x256xf32>
    tpu.vector_store %arg15[%c0_35, %c0_36], %55 {strides = array<i32>} : memref<8x256xf32, #tpu.memory_space<vmem>>, vector<8x256xf32>,
    %57 = arith.truncf %28 : vector<8x64xf32> to vector<8x64xbf16>
    %c0_37 = arith.constant 0 : index
    %c0_38 = arith.constant 0 : index
    %58 = vector.load %arg12[%c0_37, %c0_38] : memref<64x128xbf16, #tpu.memory_space<vmem>>, vector<64x128xbf16>
    %cst_39 = arith.constant dense<0.000000e+00> : vector<8x128xf32>
    %59 = tpu.matmul %57, %58, %cst_39 {dimension_numbers = #tpu.dot_dimension_numbers<[1], [0], [0], [1], [0, 0, 1, 1], [], []>} : vector<8x64xbf16>, vector<64x128xbf16>, vector<8x128xf32> -> vector<8x128xf32>
    %c0_40 = arith.constant 0 : index
    %c0_41 = arith.constant 0 : index
    %60 = vector.load %arg13[%c0_40, %c0_41] : memref<1x128xf32, #tpu.memory_space<vmem>>, vector<1x128xf32>
    %61 = vector.broadcast %60 : vector<1x128xf32> to vector<8x128xf32>
    %62 = arith.addf %59, %61 : vector<8x128xf32>
    %c0_42 = arith.constant 0 : index
    %c0_43 = arith.constant 0 : index
    %63 = vector.load %arg16[%c0_42, %c0_43] : memref<8x128xf32, #tpu.memory_space<vmem>>, vector<8x128xf32>
    tpu.vector_store %arg16[%c0_42, %c0_43], %62 {strides = array<i32>} : memref<8x128xf32, #tpu.memory_space<vmem>>, vector<8x128xf32>,
    return
  }
}

</mosaic_0001>

<bundles_post_ra>
// kernel: dvgrl_forward.1
= control target key start
LH: loop header
LB: loop body
LE: loop exit
PB: predicated region body
PF: predicated region fallthrough
CT: control target
= control target key end

     0   :  { %s1992_s0 = inlined_call_operand.vmem [shape: bf16[8,128], index: 0, kind: input, shape index: {}]   ;;  %s1993_s1 = inlined_call_operand.vmem [shape: bf16[128,256], index: 1, kind: input, shape index: {}]   ;;  %s1994_s2 = inlined_call_operand.vmem [shape: bf16[128,128], index: 2, kind: input, shape index: {}]   ;;  %s1995_s3 = inlined_call_operand.vmem [shape: bf16[256,128], index: 3, kind: input, shape index: {}]   ;;  %s1996_s4 = inlined_call_operand.vmem [shape: f32[1,128], index: 4, kind: input, shape index: {}]   ;;  %s1997_s5 = inlined_call_operand.vmem [shape: bf16[128,128], index: 5, kind: input, shape index: {}]   ;;  %s1998_s6 = inlined_call_operand.vmem [shape: f32[1,128], index: 6, kind: input, shape index: {}]   ;;  %s1999_s7 = inlined_call_operand.vmem [shape: bf16[128,64], index: 7, kind: input, shape index: {}]   ;;  %s2000_s8 = inlined_call_operand.vmem [shape: f32[1,64], index: 8, kind: input, shape index: {}]   ;;  %s2001_s9 = inlined_call_operand.vmem [shape: f32[1,64], index: 9, kind: input, shape index: {}]   ;;  %s2002_s10 = inlined_call_operand.vmem [shape: bf16[64,256], index: 10, kind: input, shape index: {}]   ;;  %s2003_s11 = inlined_call_operand.vmem [shape: f32[1,256], index: 11, kind: input, shape index: {}]   ;;  %s2004_s12 = inlined_call_operand.vmem [shape: bf16[64,128], index: 12, kind: input, shape index: {}]   ;;  %s2005_s13 = inlined_call_operand.vmem [shape: f32[1,128], index: 13, kind: input, shape index: {}]   ;;  %s2006_s14 = inlined_call_operand.vmem [shape: f32[128,256], index: 14, kind: output, shape index: {0}]   ;;  %s2007_s15 = inlined_call_operand.hbm [shape: f32[8,256], index: 15, kind: output, shape index: {1}]   ;;  %s2008_s16 = inlined_call_operand.hbm [shape: f32[8,128], index: 16, kind: output, shape index: {2}]   ;;  %s2009_s17 = inlined_call_operand.vmem [shape: f32[8,128], index: 17, kind: output, shape index: {3}]  }
   0x1   :  { %2011 = sst [smem:[#allocation8_spill]] %s1992_s0 }
   0x2   :  { %2012 = sst [smem:[#allocation9_spill]] %s1993_s1 }
   0x3   :  { %23 = vsyncpa [#allocation3], 0  ;;  %v1232_v0 = vld [vmem:[%s1995_s3 + $0x38] sm:$0xff]  ;;  %v1231_v2 = vld [vmem:[%s1995_s3 + $0x30] sm:$0xff] }
   0x4   :  { %v1240_v1 = vld [vmem:[%s1995_s3 + $0x78] sm:$0xff]  ;;  %282 = vmatpush.bf16.msra.mxu0 %v1232_v0  ;;  %v1239_v3 = vld [vmem:[%s1995_s3 + $0x70] sm:$0xff]  ;;  %v1230_v6 = vld [vmem:[%s1995_s3 + $0x28] sm:$0xff] }
   0x5   :  { %331 = vmatpush.bf16.msra.mxu1 %v1240_v1  ;;  %v1256_v4 = vld [vmem:[%s1997_s5 + $0x38] sm:$0xff]  ;;  %v1255_v5 = vld [vmem:[%s1997_s5 + $0x30] sm:$0xff]  ;;  %v1238_v7 = vld [vmem:[%s1995_s3 + $0x68] sm:$0xff] }
   0x6   :  { %512 = vmatpush.bf16.msra.mxu2 %v1256_v4  ;;  %v1229_v8 = vld [vmem:[%s1995_s3 + $0x20] sm:$0xff]  ;;  %v1254_v10 = vld [vmem:[%s1997_s5 + $0x28] sm:$0xff] }
   0x7   :  { %v1237_v9 = vld [vmem:[%s1995_s3 + $0x60] sm:$0xff] }
   0x8   :  { %283 = vmatpush.bf16.msra.mxu0 %v1231_v2 }
   0x9   :  { %332 = vmatpush.bf16.msra.mxu1 %v1239_v3 }
   0xa   :  { %513 = vmatpush.bf16.msra.mxu2 %v1255_v5 }
   0xc   :  { %284 = vmatpush.bf16.msra.mxu0 %v1230_v6 }
   0xd   :  { %333 = vmatpush.bf16.msra.mxu1 %v1238_v7 }
   0xe   :  { %24 = vsyncpa [#allocation5], 0  ;;  %514 = vmatpush.bf16.msra.mxu2 %v1254_v10  ;;  %v1253_v11 = vld [vmem:[%s1997_s5 + $0x20] sm:$0xff]  ;;  %v1228_v12 = vld [vmem:[%s1995_s3 + $0x18] sm:$0xff]  ;;  %s2013_s25 = sld [smem:[#allocation9_spill]]  ;;  %s1343_s19 = smov 64  }
   0xf   :  { %v1236_v13 = vld [vmem:[%s1995_s3 + $0x58] sm:$0xff]  ;;  %v1227_v15 = vld [vmem:[%s1995_s3 + $0x10] sm:$0xff]  ;;  %v1226_v18 = vld [vmem:[%s1995_s3 + $0x8] sm:$0xff]  ;;  %s2014_s18 = sld [smem:[#allocation8_spill]]  ;;  %vm656_vm0 = vcmask 523264   ;;  %s1344_s30 = smov [#allocation2]  }
  0x10   :  { %285 = vmatpush.bf16.msra.mxu0 %v1229_v8  ;;  %v1252_v14 = vld [vmem:[%s1997_s5 + $0x18] sm:$0xff]  ;;  %v1235_v16 = vld [vmem:[%s1995_s3 + $0x50] sm:$0xff]  ;;  %v1234_v19 = vld [vmem:[%s1995_s3 + $0x48] sm:$0xff] }
  0x11   :  { %334 = vmatpush.bf16.msra.mxu1 %v1237_v9  ;;  %v1251_v17 = vld [vmem:[%s1997_s5 + $0x10] sm:$0xff]  ;;  %v1225_v20 = vld [vmem:[%s1995_s3] sm:$0xff]  ;;  %v1250_v23 = vld [vmem:[%s1997_s5 + $0x8] sm:$0xff] }
  0x12   :  { %515 = vmatpush.bf16.msra.mxu2 %v1253_v11  ;;  %v1233_v21 = vld [vmem:[%s1995_s3 + $0x40] sm:$0xff]  ;;  %v1242_v37 = vld [vmem:[%s1994_s2 + $0x8] sm:$0xff]  ;;  %v1243_v44 = vld [vmem:[%s1994_s2 + $0x10] sm:$0xff] }
  0x13   :  { %v1249_v29 = vld [vmem:[%s1997_s5] sm:$0xff]  ;;  %v1244_v51 = vld [vmem:[%s1994_s2 + $0x18] sm:$0xff]  ;;  %v1246_v1 = vld [vmem:[%s1994_s2 + $0x28] sm:$0xff] }
  0x14   :  { %286 = vmatpush.bf16.msra.mxu0 %v1228_v12  ;;  %v936_v22 = vld [vmem:[%s2013_s25] sm:$0xf]  ;;  %v1210_v24 = vld [vmem:[%s2013_s25 + $0x4] sm:$0xf0]  ;;  %v1209_v25 = vld [vmem:[%s2013_s25 + $0x4] sm:$0xf] }
  0x15   :  { %335 = vmatpush.bf16.msra.mxu1 %v1236_v13  ;;  %v938_v26 = vld [vmem:[%s2013_s25 + $0x8] sm:$0xf0]  ;;  %v937_v27 = vor.u32 %v1210_v24, %v936_v22  ;;  %v1241_v30 = vld [vmem:[%s1994_s2] sm:$0xff]  ;;  %v944_v31 = vld [vmem:[%s2013_s25 + $0x10] sm:$0xf] }
  0x16   :  { %516 = vmatpush.bf16.msra.mxu2 %v1252_v14  ;;  %v941_v28 = vor.u32 %v1209_v25, %v938_v26  ;;  %v1212_v32 = vld [vmem:[%s2013_s25 + $0x14] sm:$0xf0]  ;;  %v1211_v33 = vld [vmem:[%s2013_s25 + $0x14] sm:$0xf]  ;;  %v946_v34 = vld [vmem:[%s2013_s25 + $0x18] sm:$0xf0] }
  0x17   :  { %v945_v35 = vor.u32 %v1212_v32, %v944_v31  ;;  %v949_v36 = vor.u32 %v1211_v33, %v946_v34  ;;  %v952_v38 = vld [vmem:[%s2013_s25 + $0x20] sm:$0xf]  ;;  %v1214_v39 = vld [vmem:[%s2013_s25 + $0x24] sm:$0xf0]  ;;  %v1213_v40 = vld [vmem:[%s2013_s25 + $0x24] sm:$0xf] }
  0x18   :  { %287 = vmatpush.bf16.msra.mxu0 %v1227_v15  ;;  %v954_v41 = vld [vmem:[%s2013_s25 + $0x28] sm:$0xf0]  ;;  %v953_v42 = vor.u32 %v1214_v39, %v952_v38  ;;  %v960_v45 = vld [vmem:[%s2013_s25 + $0x30] sm:$0xf]  ;;  %v1216_v46 = vld [vmem:[%s2013_s25 + $0x34] sm:$0xf0] }
  0x19   :  { %336 = vmatpush.bf16.msra.mxu1 %v1235_v16  ;;  %v957_v43 = vor.u32 %v1213_v40, %v954_v41  ;;  %v1215_v47 = vld [vmem:[%s2013_s25 + $0x34] sm:$0xf]  ;;  %v962_v48 = vld [vmem:[%s2013_s25 + $0x38] sm:$0xf0]  ;;  %v961_v49 = vor.u32 %v1216_v46, %v960_v45  ;;  %v968_v52 = vld [vmem:[%s2013_s25 + $0x40] sm:$0xf] }
  0x1a   :  { %517 = vmatpush.bf16.msra.mxu2 %v1251_v17  ;;  %v965_v50 = vor.u32 %v1215_v47, %v962_v48  ;;  %v1218_v53 = vld [vmem:[%s2013_s25 + $0x44] sm:$0xf0]  ;;  %v1217_v54 = vld [vmem:[%s2013_s25 + $0x44] sm:$0xf]  ;;  %v970_v55 = vld [vmem:[%s2013_s25 + $0x48] sm:$0xf0] }
  0x1b   :  { %v969_v56 = vor.u32 %v1218_v53, %v968_v52  ;;  %v973_v57 = vor.u32 %v1217_v54, %v970_v55  ;;  %v1245_v58 = vld [vmem:[%s1994_s2 + $0x20] sm:$0xff]  ;;  %v976_v59 = vld [vmem:[%s2013_s25 + $0x50] sm:$0xf]  ;;  %v1220_v60 = vld [vmem:[%s2013_s25 + $0x54] sm:$0xf0] }
  0x1c   :  { %288 = vmatpush.bf16.msra.mxu0 %v1226_v18  ;;  %v1219_v61 = vld [vmem:[%s2013_s25 + $0x54] sm:$0xf]  ;;  %v978_v62 = vld [vmem:[%s2013_s25 + $0x58] sm:$0xf0]  ;;  %v977_v63 = vor.u32 %v1220_v60, %v976_v59  ;;  %v984_v2 = vld [vmem:[%s2013_s25 + $0x60] sm:$0xf] }
  0x1d   :  { %337 = vmatpush.bf16.msra.mxu1 %v1234_v19  ;;  %v981_v0 = vor.u32 %v1219_v61, %v978_v62  ;;  %v1222_v3 = vld [vmem:[%s2013_s25 + $0x64] sm:$0xf0]  ;;  %v1221_v4 = vld [vmem:[%s2013_s25 + $0x64] sm:$0xf]  ;;  %v986_v5 = vld [vmem:[%s2013_s25 + $0x68] sm:$0xf0] }
  0x1e   :  { %518 = vmatpush.bf16.msra.mxu2 %v1250_v23  ;;  %v985_v6 = vor.u32 %v1222_v3, %v984_v2  ;;  %v989_v7 = vor.u32 %v1221_v4, %v986_v5  ;;  %v1247_v8 = vld [vmem:[%s1994_s2 + $0x30] sm:$0xff]  ;;  %v1224_v10 = vld [vmem:[%s2013_s25 + $0x74] sm:$0xf0]  ;;  %v994_v12 = vld [vmem:[%s2013_s25 + $0x78] sm:$0xf0] }
  0x1f   :  { %v992_v9 = vld [vmem:[%s2013_s25 + $0x70] sm:$0xf]  ;;  %v1223_v11 = vld [vmem:[%s2013_s25 + $0x74] sm:$0xf]  ;;  %v1248_v15 = vld [vmem:[%s1994_s2 + $0x38] sm:$0xff] }
  0x20   :  { %289 = vmatpush.bf16.msra.mxu0 %v1225_v20  ;;  %v993_v13 = vor.u32 %v1224_v10, %v992_v9  ;;  %v997_v14 = vor.u32 %v1223_v11, %v994_v12  ;;  %v1631_v16 = vld [vmem:[%s1996_s4] ss:$0 sm:$0xff]  ;;  %s903_s4 = sshll.u32 %s2007_s15, 4  ;;  %s904_s4 = int_to_ptr.hbm [resolvable:$true] %s903_s4 }
  0x21   :  { %338 = vmatpush.bf16.msra.mxu1 %v1233_v21  ;;  %v1643_v21 = vld [vmem:[%s1998_s6] ss:$0 sm:$0xff]  ;;  %s1345_s6 = smov [#allocation4]  }
  0x22   :  { %519 = vmatpush.bf16.msra.mxu2 %v1249_v29 }
  0x23   :  { %290 = vmatmul.bf16.vlgmr.msra.gmra.mxu0 %v937_v27 }
  0x24   :  { %339 = vmatmul.bf16.vlgmr.msra.gmra.mxu1 %v941_v28 }
  0x25   :  { %520 = vmatmul.bf16.vlgmr.msra.gmra.mxu2 %v1241_v30 }
  0x33   :  { %295 = vmatmul.bf16.gmra.mxu0 %v945_v35 }
  0x34   :  { %344 = vmatmul.bf16.gmra.mxu1 %v949_v36 }
  0x35   :  { %525 = vmatmul.bf16.gmra.mxu2 %v1242_v37 }
  0x43   :  { %300 = vmatmul.bf16.gmra.mxu0 %v953_v42 }
  0x44   :  { %349 = vmatmul.bf16.gmra.mxu1 %v957_v43 }
  0x45   :  { %530 = vmatmul.bf16.gmra.mxu2 %v1243_v44 }
  0x53   :  { %305 = vmatmul.bf16.gmra.mxu0 %v961_v49 }
  0x54   :  { %354 = vmatmul.bf16.gmra.mxu1 %v965_v50 }
  0x55   :  { %535 = vmatmul.bf16.gmra.mxu2 %v1244_v51 }
  0x63   :  { %310 = vmatmul.bf16.gmra.mxu0 %v969_v56 }
  0x64   :  { %359 = vmatmul.bf16.gmra.mxu1 %v973_v57 }
  0x65   :  { %540 = vmatmul.bf16.gmra.mxu2 %v1245_v58 }
  0x73   :  { %315 = vmatmul.bf16.gmra.mxu0 %v977_v63 }
  0x74   :  { %364 = vmatmul.bf16.gmra.mxu1 %v981_v0 }
  0x75   :  { %545 = vmatmul.bf16.gmra.mxu2 %v1246_v1 }
  0x83   :  { %320 = vmatmul.bf16.gmra.mxu0 %v985_v6 }
  0x84   :  { %369 = vmatmul.bf16.gmra.mxu1 %v989_v7 }
  0x85   :  { %550 = vmatmul.bf16.gmra.mxu2 %v1247_v8 }
  0x93   :  { %325 = vmatmul.bf16.gmra.mxu0 %v993_v13 }
  0x94   :  { %374 = vmatmul.bf16.gmra.mxu1 %v997_v14 }
  0x95   :  { %555 = vmatmul.bf16.gmra.mxu2 %v1248_v15 }
  0xa0   :  { %v291_v17 = vpop.f32.mrf.mxu0 }
  0xa1   :  { %v340_v18 = vpop.f32.mrf.mxu1  ;;  %v292_v19 = vadd.f32 %v1631_v16, %v291_v17 }
  0xa3   :  { %v1634_v20 = vadd.f32 %v340_v18, %v292_v19 }
  0xa5   :  { %561 = vst [vmem:[%s2006_s14] sm:$0xff] %v1634_v20 }
  0xa8   :  { %v293_v22 = vpop.f32.mrf.mxu0  ;;  %v521_v25 = vpop.f32.mrf.mxu2 }
  0xa9   :  { %v342_v23 = vpop.f32.mrf.mxu1  ;;  %v294_v24 = vadd.f32 %v1631_v16, %v293_v22  ;;  %v1649_v27 = vadd.f32 %v1643_v21, %v521_v25 }
  0xab   :  { %v1646_v26 = vadd.f32 %v342_v23, %v294_v24  ;;  %562 = vst [vmem:[%s2006_s14 + $0x8] sm:$0xff] %v1649_v27 }
  0xad   :  { %563 = vst [vmem:[%s2006_s14 + $0x10] sm:$0xff] %v1646_v26  ;;  %v594_v28 = vpack.c.bf16 %v1646_v26, %v1634_v20 }
  0xb0   :  { %v296_v29 = vpop.f32.mrf.mxu0  ;;  %v523_v32 = vpop.f32.mrf.mxu2 }
  0xb1   :  { %v345_v30 = vpop.f32.mrf.mxu1  ;;  %v297_v31 = vadd.f32 %v1631_v16, %v296_v29  ;;  %v1665_v34 = vadd.f32 %v1643_v21, %v523_v32 }
  0xb3   :  { %v1662_v33 = vadd.f32 %v345_v30, %v297_v31  ;;  %v595_v35 = vpack.c.bf16 %v1665_v34, %v1649_v27  ;;  %564 = vst [vmem:[%s2006_s14 + $0x18] sm:$0xff] %v1665_v34  ;;  %v1264_v27 = vld [vmem:[%s1999_s7 + $0x38] sm:$0xff]  ;;  %v1263_v34 = vld [vmem:[%s1999_s7 + $0x30] sm:$0xff] }
  0xb5   :  { %565 = vst [vmem:[%s2006_s14 + $0x20] sm:$0xff] %v1662_v33 }
  0xb8   :  { %v298_v36 = vpop.f32.mrf.mxu0  ;;  %v526_v39 = vpop.f32.mrf.mxu2 }
  0xb9   :  { %v347_v37 = vpop.f32.mrf.mxu1  ;;  %v299_v38 = vadd.f32 %v1631_v16, %v298_v36  ;;  %v1681_v41 = vadd.f32 %v1643_v21, %v526_v39 }
  0xbb   :  { %v1678_v40 = vadd.f32 %v347_v37, %v299_v38  ;;  %566 = vst [vmem:[%s2006_s14 + $0x28] sm:$0xff] %v1681_v41 }
  0xbd   :  { %567 = vst [vmem:[%s2006_s14 + $0x30] sm:$0xff] %v1678_v40  ;;  %v596_v42 = vpack.c.bf16 %v1678_v40, %v1662_v33 }
  0xc0   :  { %v301_v43 = vpop.f32.mrf.mxu0  ;;  %v528_v46 = vpop.f32.mrf.mxu2 }
  0xc1   :  { %v350_v44 = vpop.f32.mrf.mxu1  ;;  %v302_v45 = vadd.f32 %v1631_v16, %v301_v43  ;;  %v1697_v48 = vadd.f32 %v1643_v21, %v528_v46 }
  0xc3   :  { %v1694_v47 = vadd.f32 %v350_v44, %v302_v45  ;;  %v597_v49 = vpack.c.bf16 %v1697_v48, %v1681_v41  ;;  %568 = vst [vmem:[%s2006_s14 + $0x38] sm:$0xff] %v1697_v48  ;;  %v1261_v48 = vld [vmem:[%s1999_s7 + $0x20] sm:$0xff] }
  0xc5   :  { %569 = vst [vmem:[%s2006_s14 + $0x40] sm:$0xff] %v1694_v47 }
  0xc8   :  { %v303_v50 = vpop.f32.mrf.mxu0  ;;  %v531_v53 = vpop.f32.mrf.mxu2 }
  0xc9   :  { %v352_v51 = vpop.f32.mrf.mxu1  ;;  %v304_v52 = vadd.f32 %v1631_v16, %v303_v50  ;;  %v1713_v55 = vadd.f32 %v1643_v21, %v531_v53 }
  0xcb   :  { %v1710_v54 = vadd.f32 %v352_v51, %v304_v52  ;;  %570 = vst [vmem:[%s2006_s14 + $0x48] sm:$0xff] %v1713_v55 }
  0xcd   :  { %571 = vst [vmem:[%s2006_s14 + $0x50] sm:$0xff] %v1710_v54  ;;  %v598_v56 = vpack.c.bf16 %v1710_v54, %v1694_v47 }
  0xd0   :  { %v306_v57 = vpop.f32.mrf.mxu0  ;;  %v533_v60 = vpop.f32.mrf.mxu2 }
  0xd1   :  { %v355_v58 = vpop.f32.mrf.mxu1  ;;  %v307_v59 = vadd.f32 %v1631_v16, %v306_v57  ;;  %v1729_v62 = vadd.f32 %v1643_v21, %v533_v60 }
  0xd3   :  { %v1726_v61 = vadd.f32 %v355_v58, %v307_v59  ;;  %v599_v63 = vpack.c.bf16 %v1729_v62, %v1713_v55  ;;  %572 = vst [vmem:[%s2006_s14 + $0x58] sm:$0xff] %v1729_v62  ;;  %v1258_v62 = vld [vmem:[%s1999_s7 + $0x8] sm:$0xff] }
  0xd5   :  { %573 = vst [vmem:[%s2006_s14 + $0x60] sm:$0xff] %v1726_v61 }
  0xd8   :  { %v308_v0 = vpop.f32.mrf.mxu0  ;;  %v536_v3 = vpop.f32.mrf.mxu2 }
  0xd9   :  { %v357_v1 = vpop.f32.mrf.mxu1  ;;  %v309_v2 = vadd.f32 %v1631_v16, %v308_v0  ;;  %v1745_v5 = vadd.f32 %v1643_v21, %v536_v3 }
  0xdb   :  { %v1742_v4 = vadd.f32 %v357_v1, %v309_v2  ;;  %574 = vst [vmem:[%s2006_s14 + $0x68] sm:$0xff] %v1745_v5 }
  0xdd   :  { %575 = vst [vmem:[%s2006_s14 + $0x70] sm:$0xff] %v1742_v4  ;;  %v600_v6 = vpack.c.bf16 %v1742_v4, %v1726_v61 }
  0xe0   :  { %v311_v7 = vpop.f32.mrf.mxu0  ;;  %v538_v10 = vpop.f32.mrf.mxu2 }
  0xe1   :  { %v360_v8 = vpop.f32.mrf.mxu1  ;;  %v312_v9 = vadd.f32 %v1631_v16, %v311_v7  ;;  %v1761_v12 = vadd.f32 %v1643_v21, %v538_v10 }
  0xe3   :  { %v1758_v11 = vadd.f32 %v360_v8, %v312_v9  ;;  %v601_v13 = vpack.c.bf16 %v1761_v12, %v1745_v5  ;;  %576 = vst [vmem:[%s2006_s14 + $0x78] sm:$0xff] %v1761_v12 }
  0xe5   :  { %577 = vst [vmem:[%s2006_s14 + $0x80] sm:$0xff] %v1758_v11 }
  0xe8   :  { %v313_v14 = vpop.f32.mrf.mxu0  ;;  %v541_v18 = vpop.f32.mrf.mxu2 }
  0xe9   :  { %v362_v15 = vpop.f32.mrf.mxu1  ;;  %v314_v17 = vadd.f32 %v1631_v16, %v313_v14  ;;  %v1777_v22 = vadd.f32 %v1643_v21, %v541_v18 }
  0xeb   :  { %v1774_v19 = vadd.f32 %v362_v15, %v314_v17  ;;  %578 = vst [vmem:[%s2006_s14 + $0x88] sm:$0xff] %v1777_v22 }
  0xed   :  { %579 = vst [vmem:[%s2006_s14 + $0x90] sm:$0xff] %v1774_v19 }
  0xf0   :  { %v316_v23 = vpop.f32.mrf.mxu0  ;;  %v543_v29 = vpop.f32.mrf.mxu2 }
  0xf1   :  { %v365_v24 = vpop.f32.mrf.mxu1  ;;  %v317_v25 = vadd.f32 %v1631_v16, %v316_v23  ;;  %v1789_v31 = vadd.f32 %v1643_v21, %v543_v29 }
  0xf3   :  { %v366_v30 = vadd.f32 %v365_v24, %v317_v25  ;;  %v603_v32 = vpack.c.bf16 %v1789_v31, %v1777_v22  ;;  %580 = vst [vmem:[%s2006_s14 + $0x98] sm:$0xff] %v1789_v31  ;;  %v1184_v31 = vld [vmem:[%s2002_s10 + $0x30] sm:$0xf] }
  0xf5   :  { %581 = vst [vmem:[%s2006_s14 + $0xa0] sm:$0xff] %v366_v30 }
  0xf8   :  { %v318_v36 = vpop.f32.mrf.mxu0  ;;  %v546_v39 = vpop.f32.mrf.mxu2 }
  0xf9   :  { %v367_v37 = vpop.f32.mrf.mxu1  ;;  %v319_v38 = vadd.f32 %v1631_v16, %v318_v36  ;;  %v547_v44 = vadd.f32 %v1643_v21, %v546_v39  ;;  %v1176_v39 = vld [vmem:[%s2002_s10 + $0x20] sm:$0xf] }
  0xfb   :  { %v368_v43 = vadd.f32 %v367_v37, %v319_v38  ;;  %582 = vst [vmem:[%s2006_s14 + $0xa8] sm:$0xff] %v547_v44  ;;  %v602_v38 = vpack.c.bf16 %v1774_v19, %v1758_v11  ;;  %v593_v11 = vld [vmem:[%s2014_s18] sm:$0xf]  ;;  %s912_s18 = sshll.u32 %s1345_s6, 4  ;;  %s913_s18 = int_to_ptr.vmem [resolvable:$true] %s912_s18 }
  0xfd   :  { %583 = vst [vmem:[%s2006_s14 + $0xb0] sm:$0xff] %v368_v43  ;;  %v604_v37 = vpack.c.bf16 %v368_v43, %v366_v30 }
 0x100   :  { %v321_v45 = vpop.f32.mrf.mxu0  ;;  %v548_v51 = vpop.f32.mrf.mxu2 }
 0x101   :  { %v370_v46 = vpop.f32.mrf.mxu1  ;;  %v322_v50 = vadd.f32 %v1631_v16, %v321_v45  ;;  %v549_v53 = vadd.f32 %v1643_v21, %v548_v51 }
 0x103   :  { %v371_v52 = vadd.f32 %v370_v46, %v322_v50  ;;  %584 = vst [vmem:[%s2006_s14 + $0xb8] sm:$0xff] %v549_v53  ;;  %v605_v4 = vpack.c.bf16 %v549_v53, %v547_v44  ;;  %v1270_v44 = vld [vmem:[%s2002_s10 + $0x24] sm:$0xf0]  ;;  %v1282_v46 = vld [vmem:[%s2000_s8] ss:$0 sm:$0xff] }
 0x104   :  { %v1177_v45 = vor.u32 %v1270_v44, %v1176_v39 }
 0x105   :  { %585 = vst [vmem:[%s2006_s14 + $0xc0] sm:$0xff] %v371_v52 }
 0x108   :  { %v323_v57 = vpop.f32.mrf.mxu0  ;;  %v551_v60 = vpop.f32.mrf.mxu2 }
 0x109   :  { %v372_v58 = vpop.f32.mrf.mxu1  ;;  %v324_v59 = vadd.f32 %v1631_v16, %v323_v57  ;;  %v552_v1 = vadd.f32 %v1643_v21, %v551_v60  ;;  %v1168_v60 = vld [vmem:[%s2002_s10 + $0x10] sm:$0xf] }
 0x10b   :  { %v373_v0 = vadd.f32 %v372_v58, %v324_v59  ;;  %586 = vst [vmem:[%s2006_s14 + $0xc8] sm:$0xff] %v552_v1 }
 0x10d   :  { %587 = vst [vmem:[%s2006_s14 + $0xd0] sm:$0xff] %v373_v0  ;;  %v606_v29 = vpack.c.bf16 %v373_v0, %v371_v52  ;;  %v1283_v52 = vld [vmem:[%s2001_s9] ss:$0 sm:$0xff]  ;;  %v1268_v0 = vld [vmem:[%s2002_s10 + $0x14] sm:$0xf0] }
 0x110   :  { %v326_v2 = vpop.f32.mrf.mxu0  ;;  %v553_v8 = vpop.f32.mrf.mxu2 }
 0x111   :  { %v375_v3 = vpop.f32.mrf.mxu1  ;;  %v327_v7 = vadd.f32 %v1631_v16, %v326_v2  ;;  %v554_v10 = vadd.f32 %v1643_v21, %v553_v8  ;;  %v1160_v2 = vld [vmem:[%s2002_s10] sm:$0xf]  ;;  %v1271_v8 = vld [vmem:[%s2002_s10 + $0x34] sm:$0xf] }
 0x113   :  { %v376_v9 = vadd.f32 %v375_v3, %v327_v7  ;;  %588 = vst [vmem:[%s2006_s14 + $0xd8] sm:$0xff] %v554_v10  ;;  %v607_v61 = vpack.c.bf16 %v554_v10, %v552_v1  ;;  %v1169_v1 = vor.u32 %v1268_v0, %v1168_v60  ;;  %v1266_v3 = vld [vmem:[%s2002_s10 + $0x4] sm:$0xf0] }
 0x114   :  { %v1161_v7 = vor.u32 %v1266_v3, %v1160_v2 }
 0x115   :  { %589 = vst [vmem:[%s2006_s14 + $0xe0] sm:$0xff] %v376_v9 }
 0x118   :  { %v328_v14 = vpop.f32.mrf.mxu0  ;;  %v556_v18 = vpop.f32.mrf.mxu2 }
 0x119   :  { %v329_v15 = vadd.f32 %v1631_v16, %v328_v14  ;;  %v377_v17 = vpop.f32.mrf.mxu1  ;;  %v557_v24 = vadd.f32 %v1643_v21, %v556_v18  ;;  %v1269_v14 = vld [vmem:[%s2002_s10 + $0x24] sm:$0xf]  ;;  %v1267_v18 = vld [vmem:[%s2002_s10 + $0x14] sm:$0xf] }
 0x11b   :  { %v378_v23 = vadd.f32 %v377_v17, %v329_v15  ;;  %590 = vst [vmem:[%s2006_s14 + $0xe8] sm:$0xff] %v557_v24  ;;  %v1178_v15 = vld [vmem:[%s2002_s10 + $0x28] sm:$0xf0] }
 0x11c   :  { %v1181_v17 = vor.u32 %v1269_v14, %v1178_v15 }
 0x11d   :  { %591 = vst [vmem:[%s2006_s14 + $0xf0] sm:$0xff] %v378_v23  ;;  %v608_v25 = vpack.c.bf16 %v378_v23, %v376_v9  ;;  %v1186_v9 = vld [vmem:[%s2002_s10 + $0x38] sm:$0xf0] }
 0x11e   :  { %v1189_v10 = vor.u32 %v1271_v8, %v1186_v9  ;;  %v1170_v23 = vld [vmem:[%s2002_s10 + $0x18] sm:$0xf0] }
 0x11f   :  { %610 = vmatpush.bf16.msra.mxu3 %v608_v25  ;;  %v1265_v25 = vld [vmem:[%s2002_s10 + $0x4] sm:$0xf] }
 0x120   :  { %v558_v36 = vpop.f32.mrf.mxu2 }
 0x121   :  { %v559_v16 = vadd.f32 %v1643_v21, %v558_v36 }
 0x123   :  { %611 = vmatpush.bf16.msra.mxu3 %v606_v29  ;;  %592 = vst [vmem:[%s2006_s14 + $0xf8] sm:$0xff] %v559_v16  ;;  %v609_v21 = vpack.c.bf16 %v559_v16, %v557_v24  ;;  %v1173_v24 = vor.u32 %v1267_v18, %v1170_v23  ;;  %v1162_v29 = vld [vmem:[%s2002_s10 + $0x8] sm:$0xf0] }
 0x124   :  { %v1165_v36 = vor.u32 %v1265_v25, %v1162_v29 }
 0x127   :  { %612 = vmatpush.bf16.msra.mxu3 %v604_v37 }
 0x12b   :  { %613 = vmatpush.bf16.msra.mxu3 %v602_v38 }
 0x12f   :  { %614 = vmatpush.bf16.msra.mxu3 %v600_v6  ;;  %v1257_v6 = vld [vmem:[%s1999_s7] sm:$0xff] }
 0x133   :  { %615 = vmatpush.bf16.msra.mxu3 %v598_v56  ;;  %v1259_v56 = vld [vmem:[%s1999_s7 + $0x10] sm:$0xff] }
 0x137   :  { %616 = vmatpush.bf16.msra.mxu3 %v596_v42 }
 0x13b   :  { %617 = vmatpush.bf16.msra.mxu3 %v594_v28 }
 0x13e   :  { %618 = vmatmul.bf16.vlgmr.msra.gmra.mxu3 %v593_v11 }
 0x13f   :  { %623 = vmatpush.bf16.msrb.mxu3 %v609_v21 }
 0x143   :  { %624 = vmatpush.bf16.msrb.mxu3 %v607_v61  ;;  %v1276_v61 = vld [vmem:[%s2004_s12 + $0x18] sm:$0xff] }
 0x147   :  { %625 = vmatpush.bf16.msrb.mxu3 %v605_v4 }
 0x14b   :  { %626 = vmatpush.bf16.msrb.mxu3 %v603_v32  ;;  %v1272_v32 = vld [vmem:[%s2002_s10 + $0x34] sm:$0xf0] }
 0x14c   :  { %v1185_v43 = vor.u32 %v1272_v32, %v1184_v31 }
 0x14f   :  { %627 = vmatpush.bf16.msrb.mxu3 %v601_v13 }
 0x153   :  { %628 = vmatpush.bf16.msrb.mxu3 %v599_v63 }
 0x157   :  { %629 = vmatpush.bf16.msrb.mxu3 %v597_v49  ;;  %v1260_v49 = vld [vmem:[%s1999_s7 + $0x18] sm:$0xff] }
 0x15b   :  { %630 = vmatpush.bf16.msrb.mxu3 %v595_v35  ;;  %v1262_v35 = vld [vmem:[%s1999_s7 + $0x28] sm:$0xff]  ;;  %s914_s7 = sshll.u32 %s2008_s16, 4  ;;  %s915_s7 = int_to_ptr.hbm [resolvable:$true] %s914_s7 }
 0x15e   :  { %631 = vmatmul.bf16.vlgmr.msrb.gmra.mxu3 %v593_v11 }
 0x15f   :  { %728 = vmatpush.bf16.msra.mxu3 %v1264_v27 }
 0x163   :  { %729 = vmatpush.bf16.msra.mxu3 %v1263_v34 }
 0x167   :  { %730 = vmatpush.bf16.msra.mxu3 %v1262_v35 }
 0x16b   :  { %731 = vmatpush.bf16.msra.mxu3 %v1261_v48  ;;  %v1284_v48 = vld [vmem:[%s2005_s13] ss:$0 sm:$0xff] }
 0x16f   :  { %732 = vmatpush.bf16.msra.mxu3 %v1260_v49 }
 0x173   :  { %733 = vmatpush.bf16.msra.mxu3 %v1259_v56 }
 0x177   :  { %734 = vmatpush.bf16.msra.mxu3 %v1258_v62 }
 0x17b   :  { %735 = vmatpush.bf16.msra.mxu3 %v1257_v6 }
 0x17f   :  { %816 = vmatpush.bf16.msrb.mxu3 %v1185_v43 }
 0x183   :  { %817 = vmatpush.bf16.msrb.mxu3 %v1177_v45 }
 0x187   :  { %818 = vmatpush.bf16.msrb.mxu3 %v1169_v1 }
 0x18b   :  { %819 = vmatpush.bf16.msrb.mxu3 %v1161_v7 }
 0x1c1   :  { %v619_v20 = vpop.f32.mrf.mxu3 }
 0x1c2   :  { %v636_v42 = vmul.f32 0.5, %v619_v20 }
 0x1c4   :  { %v637_v54 = vmul.f32 1.442695, %v636_v42 }
 0x1c9   :  { %v621_v26 = vpop.f32.mrf.mxu3 }
 0x1ca   :  { %v1274_v26 = vld [vmem:[%s2004_s12 + $0x8] sm:$0xff] }
 0x1e1   :  { %v632_v28 = vpop.f32.mrf.mxu3 }
 0x1e2   :  { %v644_v33 = vmul.f32 0.5, %v632_v28 }
 0x1e4   :  { %v645_v40 = vmul.f32 1.442695, %v644_v33 }
 0x1e6   :  { %1285 = vpow2.f32 %v645_v40  ;;  %v763_v40 = vld [vmem:[%s2003_s11] sm:$0x3] }
 0x1e7   :  { %1287 = vpow2.f32 %v637_v54  ;;  %v765_v42 = vperm.slane %v763_v40, 0 }
 0x1e9   :  { %v634_v47 = vpop.f32.mrf.mxu3 }
 0x1ec   :  { %v1286_v55 = vpop.eup %1285 }
 0x1ed   :  { %648 = vrot.lane.b32.xlu0 %v1286_v55, %s1343_s19  ;;  %v1288_v41 = vpop.eup %1287 }
 0x1f5   :  { %640 = vrot.lane.b32.xlu0 %v1288_v41, %s1343_s19  ;;  %v766_v41 = vperm.slane %v763_v40, 1 }
 0x25f   :  { %v649_v63 = vpop.permute.xlu0 %648 }
 0x260   :  { %v1897_v5 = vadd.f32 %v649_v63, %v632_v28  ;;  %v1273_v28 = vld [vmem:[%s2004_s12] sm:$0xff] }
 0x262   :  { %653 = vrot.lane.b32.xlu1 %v1897_v5, %s1343_s19  ;;  %v840_v33 = vpack.c.bf16 %v1897_v5, %v1897_v5 }
 0x267   :  { %v641_v12 = vpop.permute.xlu0 %640 }
 0x268   :  { %v643_v13 = vadd.f32 %v641_v12, %v619_v20  ;;  %v1275_v20 = vld [vmem:[%s2004_s12 + $0x10] sm:$0xff]  ;;  %s901_s12 = sshll.u32 %s1344_s30, 4  ;;  %s902_s12 = int_to_ptr.vmem [resolvable:$true] %s901_s12 }
 0x2d4   :  { %v654_v19 = vpop.permute.xlu1 %653 }
 0x2d5   :  { %v657_v22 = vsel %vm656_vm0, %v643_v13, %v654_v19 }
 0x2d6   :  { %658 = vst [vmem:[%s2009_s17] sm:$0xff] %v657_v22  ;;  %v659_v30 = vpack.c.bf16 %v657_v22, %v657_v22 }
 0x2d8   :  { %736 = vmatmul.bf16.vlgmr.msra.gmra.mxu3 %v659_v30 }
 0x2d9   :  { %829 = vmatpush.bf16.msra.mxu3 %v1189_v10 }
 0x2dd   :  { %830 = vmatpush.bf16.msra.mxu3 %v1181_v17 }
 0x2e1   :  { %831 = vmatpush.bf16.msra.mxu3 %v1173_v24 }
 0x2e5   :  { %832 = vmatpush.bf16.msra.mxu3 %v1165_v36 }
 0x35b   :  { %v737_v50 = vpop.f32.mrf.mxu3 }
 0x35c   :  { %v738_v51 = vadd.f32 %v1282_v46, %v737_v50 }
 0x35e   :  { %1289 = vtanh.f32 %v738_v51 }
 0x363   :  { %v739_v53 = vpop.f32.mrf.mxu3 }
 0x364   :  { %v1290_v57 = vpop.eup %1289 }
 0x365   :  { %v746_v58 = vmul.f32 %v1290_v57, %v1283_v52 }
 0x367   :  { %v747_v59 = vsel %vm656_vm0, %v746_v58, 0.0 }
 0x368   :  { %748 = vadd.xlane.f32.xlu1 %v747_v59 }
 0x3db   :  { %v749_v16 = vpop.xlane.xlu1 %748 }
 0x3dc   :  { %v751_v37 = vsub.f32 1.0, %v749_v16  ;;  %v750_v38 = vmul.f32 %v749_v16, %v643_v13 }
 0x3de   :  { %v752_v21 = vmul.f32 %v751_v37, %v1897_v5 }
 0x3e0   :  { %v753_v11 = vadd.f32 %v752_v21, %v750_v38 }
 0x3e2   :  { %v754_v4 = vpack.c.bf16 %v753_v11, %v753_v11 }
 0x3e4   :  { %1190 = vmatmul.msk.bf16.vlgmr.msrb.gmra.mxu3 %vm656_vm0, %v754_v4 }
 0x3e5   :  { %884 = vmatpush.bf16.msrb.mxu3 %v1276_v61 }
 0x3e9   :  { %885 = vmatpush.bf16.msrb.mxu3 %v1275_v20 }
 0x3ed   :  { %886 = vmatpush.bf16.msrb.mxu3 %v1274_v26 }
 0x3f1   :  { %887 = vmatpush.bf16.msrb.mxu3 %v1273_v28 }
 0x3f4   :  { %1191 = vmatmul.msk.bf16.vlgmr.msra.gmra.mxu3 %vm656_vm0, %v754_v4 }
 0x404   :  { %1208 = vmatmul.msk.bf16.vlgmr.msrb.gmra.mxu3 %vm656_vm0, %v840_v33 }
 0x467   :  { %v821_v47 = vpop.f32.mrf.mxu3 }
 0x468   :  { %v822_v54 = vadd.f32 %v821_v47, %v765_v42 }
 0x46a   :  { %838 = vst [vmem:[#allocation2] sm:$0xff] %v822_v54 }
 0x46f   :  { %v823_v55 = vpop.f32.mrf.mxu3 }
 0x477   :  { %v834_v27 = vpop.f32.mrf.mxu3 }
 0x478   :  { %v835_v34 = vadd.f32 %v834_v27, %v766_v41 }
 0x47a   :  { %839 = vst [vmem:[#allocation2 + $0x8] sm:$0xff] %v835_v34 }
 0x47b   :  { %906 = dma.vmem_to_hbm [thread:$0]  %s902_s12, 256, %s904_s4, [#allocation3]  }
 0x47f   :  { %v836_v35 = vpop.f32.mrf.mxu3 }
 0x487   :  { %v889_v49 = vpop.f32.mrf.mxu3 }
 0x488   :  { %v890_v56 = vadd.f32 %v1284_v48, %v889_v49 }
 0x48a   :  { %893 = vst [vmem:[#allocation4] sm:$0xff] %v890_v56 }
 0x48b   :  { %917 = dma.vmem_to_hbm [thread:$0]  %s913_s18, 128, %s915_s7, [#allocation5]  }
 0x48f   :  { %v891_v62 = vpop.f32.mrf.mxu3 }
 0x490   :  { %1339 = dma.done.wait [#allocation3], 256  }
 0x491   :  { %1340 = vsyncadd [#allocation3], 4294967040 }
 0x492   :  { %1341 = dma.done.wait [#allocation5], 128  }
 0x493   :  { %1342 = vsyncadd [#allocation5], 4294967168 }
 0x494   :  { %932 = vsyncpa [#allocation3], 1 }
 0x495   :  { %933 = vsyncpa [#allocation5], 1 }

</bundles_post_ra>
